<compile_context>
chip_gen: v6e
topology: v6e:2x2x1
jax: 0.10.0
libtpu: 0.0.40
codegen_flags: <defaults>
</compile_context>

<pallas_src>
import jax
import jax.numpy as jnp
from jax.experimental import pallas as pl
from jax.experimental.pallas import tpu as pltpu

COMPUTE_DTYPE = jnp.bfloat16   # MXU feed + z storage dtype (accumulation stays f32)
BN_EPS = 1e-5                  # nn.BatchNorm2d default


def _round_up(n, m):
    return (n + m - 1) // m * m


def _pad2(a, shape):
    return jnp.pad(a, [(0, s - d) for s, d in zip(shape, a.shape)])


def _vmem_limit(block_bytes):
    """Generation-aware VMEM request: never claim all of physical VMEM."""
    try:
        cap = int(getattr(pltpu.get_tpu_info(), "vmem_capacity_bytes", 64 << 20))
    except Exception:
        cap = 64 << 20
    ceiling = max(cap * 3 // 4, 32 << 20)   # ~48 MiB on v7x, ~96 MiB on v5e/v6e
    est = 2 * block_bytes + (8 << 20)       # double-buffered copies + headroom
    return int(min(max(est, 32 << 20), ceiling))


def init_down_params(key, in_dim, out_dim):
    k1, k2, k3, k4, k5, k6 = jax.random.split(key, 6)
    return {
        # conv1 (2x2, stride 2), math layout: row = kh*2*Cin + kw*Cin + ci, col = co
        # (== torch weight (co, ci, kh, kw) transposed to (kh, kw, ci, co), flattened)
        "w1": jax.random.normal(k1, (4 * in_dim, out_dim), jnp.float32) * 0.1,
        "b1": jax.random.normal(k2, (out_dim,), jnp.float32) * 0.1,
        # conv2 (1x1) over cat([conv1_out, maxpool]); split by source block:
        #   w2a: rows for conv1 channels, w2b: rows for maxpool channels
        "w2a": jax.random.normal(k3, (out_dim, out_dim), jnp.float32) * 0.1,
        "w2b": jax.random.normal(k4, (in_dim, out_dim), jnp.float32) * 0.1,
        "b2": jax.random.normal(k5, (out_dim,), jnp.float32) * 0.1,
        # BatchNorm2d affine
        "bn_w": 1.0 + 0.1 * jax.random.normal(k6, (out_dim,), jnp.float32),
        "bn_b": jnp.zeros((out_dim,), jnp.float32),
    }


def down_forward(x_nchw, params, block_pixels=2048):
    B, Cin, H, W = x_nchw.shape
    assert H % 2 == 0 and W % 2 == 0
    Cout = params["b2"].shape[0]
    Ho, Wo = H // 2, W // 2
    Cp = _round_up(Cout, 128)        # lane-dense output channels
    K1 = 4 * Cin
    M = B * Ho * Wo                  # valid output pixels
    cdt = COMPUTE_DTYPE

    # Single wrapper relayout (replaces the NCHW->NHWC transpose):
    # (B,Cin,H,W) -> (B,Cin,Ho,2,Wo,2) -> (B,Ho,Wo,kh,kw,Cin) -> (M, 4*Cin), bf16.
    # Last-dim ordering (kh, kw, ci) matches the w1 row layout above.
    xp = x_nchw.reshape(B, Cin, Ho, 2, Wo, 2)
    xp = jnp.transpose(xp, (0, 2, 4, 3, 5, 1)).reshape(M, K1).astype(cdt)

    # Pixel tile: large, sublane-aligned for bf16 (multiple of 16); force >= 2
    # grid steps when there is enough work so v7x's two TensorCores both run.
    P = min(block_pixels, _round_up(M, 16))
    P = max(16, _round_up(P, 16))
    if pl.cdiv(M, P) < 2 and M >= 32:
        P = _round_up(pl.cdiv(M, 2), 16)
    Mp = pl.cdiv(M, P) * P
    n_tiles = Mp // P
    need_mask = Mp != M
    if need_mask:
        xp = jnp.pad(xp, ((0, Mp - M), (0, 0)))

    # Lane-pad weights / biases; matmul weights stored bf16 (halves weight DMA).
    w1 = _pad2(params["w1"], (K1, Cp)).astype(cdt)
    w2a = _pad2(params["w2a"], (Cp, Cp)).astype(cdt)
    w2b = _pad2(params["w2b"], (Cin, Cp)).astype(cdt)
    b1 = _pad2(params["b1"].reshape(1, Cout), (1, Cp))
    b2 = _pad2(params["b2"].reshape(1, Cout), (1, Cp))

    # ------------------------------------------------------------------
    # Fused kernel: maxpool + conv1 + conv2 + partial BN statistics
    # ------------------------------------------------------------------
    def fused_kernel(x_ref, w1_ref, b1_ref, w2a_ref, w2b_ref, b2_ref, z_ref, st_ref):
        xb = x_ref[...]                                    # (P, 4*Cin) bf16

        # MaxPool2d(2, 2): per-channel max over the four taps (lane slices).
        mp = jnp.maximum(jnp.maximum(xb[:, 0 * Cin:1 * Cin], xb[:, 1 * Cin:2 * Cin]),
                         jnp.maximum(xb[:, 2 * Cin:3 * Cin], xb[:, 3 * Cin:4 * Cin]))

        # conv1 (2x2, stride 2) == a single MXU matmul, K = 4*Cin, f32 accumulate.
        h = jnp.dot(xb, w1_ref[...], preferred_element_type=jnp.float32) + b1_ref[0, :]

        # conv2 (1x1) over cat([conv1_out, maxpool]) == split matmul; concat never built.
        z = (jnp.dot(h.astype(cdt), w2a_ref[...], preferred_element_type=jnp.float32)
             + jnp.dot(mp, w2b_ref[...], preferred_element_type=jnp.float32)
             + b2_ref[0, :])

        z_ref[...] = z.astype(z_ref.dtype)                 # lane-dense bf16 store

        # Per-tile partial BN statistics from the f32 accumulator (mask padded tail).
        # NOTE: one-pass E[z^2]-E[z]^2 in f32; fine at these magnitudes but can lose
        # precision when |mean| >> std (see review).
        if need_mask:
            pix = (jax.lax.broadcasted_iota(jnp.int32, (P, 1), 0)
                   + pl.program_id(0) * P)
            z = jnp.where(pix < M, z, 0.0)
        st_ref[0, 0:1, :] = jnp.sum(z, axis=0, keepdims=True)
        st_ref[0, 1:2, :] = jnp.sum(z * z, axis=0, keepdims=True)

    x_spec = pl.BlockSpec((P, K1), lambda i: (i, 0))
    z_spec = pl.BlockSpec((P, Cp), lambda i: (i, 0))
    st_spec = pl.BlockSpec((1, 2, Cp), lambda i: (i, 0, 0))

    def full(shp):
        return pl.BlockSpec(shp, lambda i: (0,) * len(shp))

    block_bytes = (2 * P * K1                              # x block (bf16)
                   + 2 * P * Cp                            # z block (bf16)
                   + 4 * 2 * Cp                            # stats block (f32)
                   + 2 * (K1 * Cp + Cp * Cp + Cin * Cp)    # bf16 weights
                   + 4 * 2 * Cp)                           # biases (f32)

    z, st = pl.pallas_call(
        fused_kernel,
        out_shape=(jax.ShapeDtypeStruct((Mp, Cp), cdt),
                   jax.ShapeDtypeStruct((n_tiles, 2, Cp), jnp.float32)),
        grid_spec=pltpu.PrefetchScalarGridSpec(
            num_scalar_prefetch=0,
            grid=(n_tiles,),
            in_specs=[x_spec, full((K1, Cp)), full((1, Cp)),
                      full((Cp, Cp)), full((Cin, Cp)), full((1, Cp))],
            out_specs=(z_spec, st_spec)),
        compiler_params=pltpu.CompilerParams(
            dimension_semantics=("parallel",),
            vmem_limit_bytes=_vmem_limit(block_bytes)),
    )(xp, w1, b1, w2a, w2b, b2)

    # Tiny XLA reduction: global batch statistics -> per-channel scale / shift.
    ssum = jnp.sum(st[:, 0, :Cout], axis=0)
    ssq = jnp.sum(st[:, 1, :Cout], axis=0)
    mean = ssum / M
    var = jnp.maximum(ssq / M - mean * mean, 0.0)          # biased var (BN training mode)
    rstd = jax.lax.rsqrt(var + BN_EPS)
    scale = params["bn_w"] * rstd
    shift = params["bn_b"] - mean * scale

    # BN normalize + affine as plain XLA: fuses into the unavoidable
    # slice / reshape / NCHW-transpose copy of the output (no second kernel pass).
    y = z[:M, :Cout].astype(jnp.float32) * scale + shift   # (M, Cout)
    out = jnp.transpose(y.reshape(B, Ho, Wo, Cout), (0, 3, 1, 2))
    return out


# ----------------------------------------------------------------------------
# Pure-JAX reference (exactly the PyTorch forward) for the self-check.
# ----------------------------------------------------------------------------
def down_forward_ref(x_nchw, params):
    B, Cin, H, W = x_nchw.shape
    Cout = params["b2"].shape[0]
    x = jnp.transpose(x_nchw, (0, 2, 3, 1)).astype(jnp.float32)      # NHWC

    w1 = params["w1"].reshape(2, 2, Cin, Cout)                       # HWIO
    conv1 = jax.lax.conv_general_dilated(
        x, w1, window_strides=(2, 2), padding="VALID",
        dimension_numbers=("NHWC", "HWIO", "NHWC")) + params["b1"]

    xmax = jax.lax.reduce_window(x, -jnp.inf, jax.lax.max,
                                 (1, 2, 2, 1), (1, 2, 2, 1), "VALID")

    cat = jnp.concatenate([conv1, xmax], axis=-1)
    w2 = jnp.concatenate([params["w2a"], params["w2b"]], axis=0)     # (Cout+Cin, Cout)
    y = jnp.tensordot(cat, w2, axes=1) + params["b2"]

    mean = y.mean(axis=(0, 1, 2))
    var = ((y - mean) ** 2).mean(axis=(0, 1, 2))
    y = (y - mean) * jax.lax.rsqrt(var + BN_EPS) * params["bn_w"] + params["bn_b"]
    return jnp.transpose(y, (0, 3, 1, 2))


if __name__ == "__main__":
    key = jax.random.PRNGKey(0)
    kx, kp = jax.random.split(key)

    B, Cin, Cout, H, W = 2, 4, 8, 16, 16
    x = jax.random.normal(kx, (B, Cin, H, W), jnp.float32)
    params = init_down_params(kp, Cin, Cout)

    ref = down_forward_ref(x, params)

    # Default tiling: 2-way split of the pixel grid (exercises the multi-tile /
    # v7x two-TensorCore path).
    out = jax.block_until_ready(down_forward(x, params))
    assert out.shape == (B, Cout, H // 2, W // 2)
    assert jnp.allclose(out, ref, atol=5e-2, rtol=5e-2), "mismatch vs reference (default tiling)"

    # Small, non-dividing tile: exercises the padded-tail mask of the BN stats.
    out2 = jax.block_until_ready(down_forward(x, params, block_pixels=48))
    assert jnp.allclose(out2, ref, atol=5e-2, rtol=5e-2), "mismatch vs reference (tiled+masked)"

    print("KERNEL_OK")
</pallas_src>

<mosaic_0001>
module attributes {stable_mosaic.version = 11 : i64} {
  func.func @fused_kernel(%arg0: i32, %arg1: memref<64x16xbf16, #tpu.memory_space<vmem>>, %arg2: memref<16x128xbf16, #tpu.memory_space<vmem>>, %arg3: memref<1x128xf32, #tpu.memory_space<vmem>>, %arg4: memref<128x128xbf16, #tpu.memory_space<vmem>>, %arg5: memref<4x128xbf16, #tpu.memory_space<vmem>>, %arg6: memref<1x128xf32, #tpu.memory_space<vmem>>, %arg7: memref<64x128xbf16, #tpu.memory_space<vmem>>, %arg8: memref<1x2x128xf32, #tpu.memory_space<vmem>>) attributes {dimension_semantics = [#tpu.dimension_semantics<parallel>], iteration_bounds = array<i64: 2>, scalar_prefetch = 0 : i64, scratch_operands = 0 : i64, tpu.core_type = #tpu.core_type<tc>, window_params = [{transform_indices = @transform_0, window_bounds = array<i64: 64, 16>}, {pipeline_mode = #tpu.pipeline_mode<synchronous>, transform_indices = @transform_1, window_bounds = array<i64: 16, 128>}, {pipeline_mode = #tpu.pipeline_mode<synchronous>, transform_indices = @transform_2, window_bounds = array<i64: 1, 128>}, {pipeline_mode = #tpu.pipeline_mode<synchronous>, transform_indices = @transform_3, window_bounds = array<i64: 128, 128>}, {pipeline_mode = #tpu.pipeline_mode<synchronous>, transform_indices = @transform_4, window_bounds = array<i64: 4, 128>}, {pipeline_mode = #tpu.pipeline_mode<synchronous>, transform_indices = @transform_5, window_bounds = array<i64: 1, 128>}, {transform_indices = @transform_6, window_bounds = array<i64: 64, 128>}, {transform_indices = @transform_7, window_bounds = array<i64: 1, 2, 128>}]} {
    %c0 = arith.constant 0 : index
    %c0_0 = arith.constant 0 : index
    %0 = vector.load %arg1[%c0, %c0_0] : memref<64x16xbf16, #tpu.memory_space<vmem>>, vector<64x16xbf16>
    %1 = vector.extract_strided_slice %0 {offsets = [0, 0], sizes = [64, 4], strides = [1, 1]} : vector<64x16xbf16> to vector<64x4xbf16>
    %2 = vector.extract_strided_slice %0 {offsets = [0, 4], sizes = [64, 4], strides = [1, 1]} : vector<64x16xbf16> to vector<64x4xbf16>
    %3 = arith.maximumf %1, %2 : vector<64x4xbf16>
    %4 = vector.extract_strided_slice %0 {offsets = [0, 8], sizes = [64, 4], strides = [1, 1]} : vector<64x16xbf16> to vector<64x4xbf16>
    %5 = vector.extract_strided_slice %0 {offsets = [0, 12], sizes = [64, 4], strides = [1, 1]} : vector<64x16xbf16> to vector<64x4xbf16>
    %6 = arith.maximumf %4, %5 : vector<64x4xbf16>
    %7 = arith.maximumf %3, %6 : vector<64x4xbf16>
    %c0_1 = arith.constant 0 : index
    %c0_2 = arith.constant 0 : index
    %8 = vector.load %arg2[%c0_1, %c0_2] : memref<16x128xbf16, #tpu.memory_space<vmem>>, vector<16x128xbf16>
    %cst = arith.constant dense<0.000000e+00> : vector<64x128xf32>
    %9 = tpu.matmul %0, %8, %cst {dimension_numbers = #tpu.dot_dimension_numbers<[1], [0], [0], [1], [0, 0, 1, 1], [], []>} : vector<64x16xbf16>, vector<16x128xbf16>, vector<64x128xf32> -> vector<64x128xf32>
    %c0_3 = arith.constant 0 : index
    %c0_4 = arith.constant 0 : index
    %10 = vector.load %arg3[%c0_3, %c0_4] : memref<1x128xf32, #tpu.memory_space<vmem>>, vector<1x128xf32>
    %11 = vector.shape_cast %10 : vector<1x128xf32> to vector<128xf32>
    %12 = vector.shape_cast %11 : vector<128xf32> to vector<1x128xf32>
    %13 = vector.broadcast %12 : vector<1x128xf32> to vector<64x128xf32>
    %14 = arith.addf %9, %13 : vector<64x128xf32>
    %15 = arith.truncf %14 : vector<64x128xf32> to vector<64x128xbf16>
    %c0_5 = arith.constant 0 : index
    %c0_6 = arith.constant 0 : index
    %16 = vector.load %arg4[%c0_5, %c0_6] : memref<128x128xbf16, #tpu.memory_space<vmem>>, vector<128x128xbf16>
    %cst_7 = arith.constant dense<0.000000e+00> : vector<64x128xf32>
    %17 = tpu.matmul %15, %16, %cst_7 {dimension_numbers = #tpu.dot_dimension_numbers<[1], [0], [0], [1], [0, 0, 1, 1], [], []>} : vector<64x128xbf16>, vector<128x128xbf16>, vector<64x128xf32> -> vector<64x128xf32>
    %c0_8 = arith.constant 0 : index
    %c0_9 = arith.constant 0 : index
    %18 = vector.load %arg5[%c0_8, %c0_9] : memref<4x128xbf16, #tpu.memory_space<vmem>>, vector<4x128xbf16>
    %cst_10 = arith.constant dense<0.000000e+00> : vector<64x128xf32>
    %19 = tpu.matmul %7, %18, %cst_10 {dimension_numbers = #tpu.dot_dimension_numbers<[1], [0], [0], [1], [0, 0, 1, 1], [], []>} : vector<64x4xbf16>, vector<4x128xbf16>, vector<64x128xf32> -> vector<64x128xf32>
    %20 = arith.addf %17, %19 : vector<64x128xf32>
    %c0_11 = arith.constant 0 : index
    %c0_12 = arith.constant 0 : index
    %21 = vector.load %arg6[%c0_11, %c0_12] : memref<1x128xf32, #tpu.memory_space<vmem>>, vector<1x128xf32>
    %22 = vector.shape_cast %21 : vector<1x128xf32> to vector<128xf32>
    %23 = vector.shape_cast %22 : vector<128xf32> to vector<1x128xf32>
    %24 = vector.broadcast %23 : vector<1x128xf32> to vector<64x128xf32>
    %25 = arith.addf %20, %24 : vector<64x128xf32>
    %26 = arith.truncf %25 : vector<64x128xf32> to vector<64x128xbf16>
    %c0_13 = arith.constant 0 : index
    %c0_14 = arith.constant 0 : index
    %27 = vector.load %arg7[%c0_13, %c0_14] : memref<64x128xbf16, #tpu.memory_space<vmem>>, vector<64x128xbf16>
    tpu.vector_store %arg7[%c0_13, %c0_14], %26 {strides = array<i32>} : memref<64x128xbf16, #tpu.memory_space<vmem>>, vector<64x128xbf16>,
    %cst_15 = arith.constant dense<0.000000e+00> : vector<128xf32>
    %28 = vector.multi_reduction <add>, %25, %cst_15 [0] : vector<64x128xf32> to vector<128xf32>
    %29 = vector.shape_cast %28 : vector<128xf32> to vector<1x128xf32>
    %c0_16 = arith.constant 0 : index
    %c0_17 = arith.constant 0 : index
    %c0_18 = arith.constant 0 : index
    %30 = vector.load %arg8[%c0_16, %c0_17, %c0_18] : memref<1x2x128xf32, #tpu.memory_space<vmem>>, vector<1x1x128xf32>
    %31 = vector.shape_cast %30 : vector<1x1x128xf32> to vector<1x128xf32>
    %32 = vector.shape_cast %29 : vector<1x128xf32> to vector<1x1x128xf32>
    tpu.vector_store %arg8[%c0_16, %c0_17, %c0_18], %32 {strides = array<i32>} : memref<1x2x128xf32, #tpu.memory_space<vmem>>, vector<1x1x128xf32>,
    %33 = arith.mulf %25, %25 : vector<64x128xf32>
    %cst_19 = arith.constant dense<0.000000e+00> : vector<128xf32>
    %34 = vector.multi_reduction <add>, %33, %cst_19 [0] : vector<64x128xf32> to vector<128xf32>
    %35 = vector.shape_cast %34 : vector<128xf32> to vector<1x128xf32>
    %c0_20 = arith.constant 0 : index
    %c1 = arith.constant 1 : index
    %c0_21 = arith.constant 0 : index
    %36 = vector.load %arg8[%c0_20, %c1, %c0_21] : memref<1x2x128xf32, #tpu.memory_space<vmem>>, vector<1x1x128xf32>
    %37 = vector.shape_cast %36 : vector<1x1x128xf32> to vector<1x128xf32>
    %38 = vector.shape_cast %35 : vector<1x128xf32> to vector<1x1x128xf32>
    tpu.vector_store %arg8[%c0_20, %c1, %c0_21], %38 {strides = array<i32>} : memref<1x2x128xf32, #tpu.memory_space<vmem>>, vector<1x1x128xf32>,
    return
  }
  func.func @transform_0(%arg0: i32) -> (i32, i32) {
    %c0_i32 = arith.constant 0 : i32
    %c0_i32_0 = arith.constant 0 : i32
    return %arg0, %c0_i32 : i32, i32
  }
  func.func @transform_1(%arg0: i32) -> (i32, i32) {
    %c0_i32 = arith.constant 0 : i32
    %c0_i32_0 = arith.constant 0 : i32
    %c0_i32_1 = arith.constant 0 : i32
    return %c0_i32, %c0_i32_0 : i32, i32
  }
  func.func @transform_2(%arg0: i32) -> (i32, i32) {
    %c0_i32 = arith.constant 0 : i32
    %c0_i32_0 = arith.constant 0 : i32
    %c0_i32_1 = arith.constant 0 : i32
    return %c0_i32, %c0_i32_0 : i32, i32
  }
  func.func @transform_3(%arg0: i32) -> (i32, i32) {
    %c0_i32 = arith.constant 0 : i32
    %c0_i32_0 = arith.constant 0 : i32
    %c0_i32_1 = arith.constant 0 : i32
    return %c0_i32, %c0_i32_0 : i32, i32
  }
  func.func @transform_4(%arg0: i32) -> (i32, i32) {
    %c0_i32 = arith.constant 0 : i32
    %c0_i32_0 = arith.constant 0 : i32
    %c0_i32_1 = arith.constant 0 : i32
    return %c0_i32, %c0_i32_0 : i32, i32
  }
  func.func @transform_5(%arg0: i32) -> (i32, i32) {
    %c0_i32 = arith.constant 0 : i32
    %c0_i32_0 = arith.constant 0 : i32
    %c0_i32_1 = arith.constant 0 : i32
    return %c0_i32, %c0_i32_0 : i32, i32
  }
  func.func @transform_6(%arg0: i32) -> (i32, i32) {
    %c0_i32 = arith.constant 0 : i32
    %c0_i32_0 = arith.constant 0 : i32
    return %arg0, %c0_i32 : i32, i32
  }
  func.func @transform_7(%arg0: i32) -> (i32, i32, i32) {
    %c0_i32 = arith.constant 0 : i32
    %c0_i32_0 = arith.constant 0 : i32
    %c0_i32_1 = arith.constant 0 : i32
    return %arg0, %c0_i32, %c0_i32_0 : i32, i32, i32
  }
}

</mosaic_0001>

<bundles_post_ra>
// kernel: tpu_custom_call.1
= control target key start
LH: loop header
LB: loop body
LE: loop exit
PB: predicated region body
PF: predicated region fallthrough
CT: control target
= control target key end

     0   :  { %13 = vsyncpa [#allocation3], 0  ;;  %s1523_s0 = inlined_call_operand.vmem [shape: bf16[128,16], index: 0, kind: input, shape index: {}]   ;;  %s1524_s1 = inlined_call_operand.vmem [shape: bf16[16,128], index: 1, kind: input, shape index: {}]   ;;  %s1525_s2 = inlined_call_operand.vmem [shape: f32[1,128], index: 2, kind: input, shape index: {}]   ;;  %s1526_s3 = inlined_call_operand.vmem [shape: bf16[128,128], index: 3, kind: input, shape index: {}]   ;;  %s1527_s4 = inlined_call_operand.vmem [shape: bf16[4,128], index: 4, kind: input, shape index: {}]   ;;  %s1528_s5 = inlined_call_operand.vmem [shape: f32[1,128], index: 5, kind: input, shape index: {}]   ;;  %s1529_s6 = inlined_call_operand.hbm [shape: bf16[128,128], index: 6, kind: output, shape index: {0}]   ;;  %s1530_s7 = inlined_call_operand.hbm [shape: f32[2,2,128], index: 7, kind: output, shape index: {1}]  }
   0x1   :  { %15 = vsyncpa [#allocation3 + $0x1], 0 }
   0x2   :  { %16 = vsyncpa [#allocation5], 0 }
   0x3   :  { %18 = vsyncpa [#allocation5 + $0x1], 0  ;;  %s1302_s24 = smov 0   ;;  %s1304_s25 = smov 0  }
   0x4   :  { %s1306_s26 = smov 0   ;;  %s1308_s27 = smov 0  }
   0x5 LB: > { %s1323_s28 = sadd.s32 4294967295, %s1254_s27   ;;  %s938_s29 = sadd.s32 4294967294, %s1254_s27   ;;  %s1254_s27 = sphi %s1308_s27, %s1536_s27   ;;  %s1250_s26 = sphi %s1306_s26, %s1535_s26   ;;  %s1246_s25 = sphi %s1304_s25, %s1534_s25   ;;  %s1242_s24 = sphi %s1302_s24, %s1533_s24  }
   0x6   : > { %s1327_s30 = sadd.s32 1, %s1254_s27   ;;  %s162_s8 = sadd.s32 1, %s1250_s26 }
   0x7   : > { %s159_s9 = ssub.s32 %s1254_s27, %s1327_s30  ;;  %p172_p0 = scmp.ne.s32.totalorder %s1250_s26, %s1246_s25 }
   0x8   : > { %p160_p1 = scmp.eq.s32.totalorder %s159_s9, 0  ;;  %p173_p2 = scmp.eq.s32.totalorder %s1323_s28, 1 }
   0x9   : > { %p178_p3 = scmp.ne.s32.totalorder %s1246_s25, %s1242_s24  ;;  %p179_p4 = scmp.eq.s32.totalorder %s938_s29, 1 }
   0xa   : > { %s1338_s10 = scalar_select %p160_p1, %s1250_s26, %s162_s8  }
   0xb   : > { %p1340_p5 = por %p173_p2, %p172_p0  ;;  %p1344_p6 = por %p179_p4, %p178_p3 }
   0xc   : > { %p941_p7 = scmp.ge.s32.totalorder %s1254_s27, 1  ;;  %p247_p8 = scmp.lt.s32.totalorder %s1254_s27, 3 }
   0xe   : > { %p248_p9 = pnand %p941_p7, %p247_p8 }
   0xf   : > { %s944_s13 = sshll.u32 (!%p248_p9), %s1323_s28, 3  ;;  %s1256_s20 = smov (!%p248_p9), 124  }
  0x10   : > { %251 = sbr.rel (%p248_p9) target bundleno = 547 (0x223), region = 44  ;;  %p285_p10 = scmp.lt.s32.totalorder (!%p248_p9), %s944_s13, 15 }
  0x11   : > { %s1257_s8 = smov (!%p248_p9), 120   ;;  %s1444_s14 = sand.u32 (!%p248_p9), 1, %s1246_s25  }
  0x12   : > { %s942_s17 = sshll.u32 (!%p248_p9), %s1444_s14, 5  ;;  %s813_s29 = scalar_lea.sflag (!%p248_p9), [#allocation3], %s1444_s14 }
  0x13   : > { %s1450_s18 = scalar_lea.vmem (!%p248_p9), [#allocation2], %s942_s17  ;;  %s1258_s9 = smov (!%p248_p9), [#allocation2]  }
  0x15   : > { %v1154_v0 = vld [vmem:[%s1524_s1] sm:$0xff]   ;;  %s1538_s13 = smov (!%p285_p10, %s944_s13), 15  ;;  %vm407_vm0 = vcmask 130048   ;;  %v1363_v10 = vld [vmem:[%s1526_s3 + $0x38] sm:$0xff]   ;;  %v1368_v13 = vld [vmem:[%s1526_s3 + $0x30] sm:$0xff]   ;;  %vm539_vm1 = vcmask 1041408  }
  0x16   : > { %1042 = vmatprep.subr.bf16.mxu0 %v1154_v0  ;;  %s945_s16 = sshll.u32 %s1538_s13, 2  ;;  %v1376_v15 = vld [vmem:[%s1526_s3 + $0x28] sm:$0xff]   ;;  %v1384_v16 = vld [vmem:[%s1526_s3 + $0x20] sm:$0xff]   ;;  %v1391_v17 = vld [vmem:[%s1526_s3 + $0x18] sm:$0xff]   ;;  %vm526_vm2 = vcmask 31744   ;;  %s1168_s13 = sshll.u32 %s1258_s9, 4  ;;  %s1169_s13 = int_to_ptr.vmem [resolvable:$false] %s1168_s13 }
  0x17   : > { %1043 = vmatpush3.bf16.msra.mxu0 %v1154_v0  ;;  %s288_s19 = scalar_lea.vmem %s1523_s0, %s945_s16  ;;  %v1399_v18 = vld [vmem:[%s1526_s3 + $0x10] sm:$0xff]   ;;  %v1406_v19 = vld [vmem:[%s1526_s3 + $0x8] sm:$0xff]   ;;  %v505_v20 = vld [vmem:[%s1527_s4] sm:$0x3]  ;;  %s1170_s15 = scalar_lea.vmem %s1169_s13, 1024 }
  0x18   : > { %v292_v1 = vld [vmem:[%s288_s19] sm:$0xf]  ;;  %v294_v2 = vld [vmem:[%s288_s19 + $0x8] sm:$0xf]  ;;  %v293_v3 = vld [vmem:[%s288_s19 + $0x4] sm:$0xf]  ;;  %1062 = vmatprep.subr.bf16.mxu0 %v1363_v10  ;;  %1102 = vmatprep.subr.msk.bf16.mxu1 %vm539_vm1, %v505_v20 }
  0x19   : > { %308 = vrot.lane.b32.xlu0 %v292_v1, %s1256_s20  ;;  %312 = vrot.lane.b32.xlu1 %v294_v2, %s1256_s20  ;;  %v295_v4 = vld [vmem:[%s288_s19 + $0xc] sm:$0xf]  ;;  %v947_v5 = vcombine.low %v292_v1, %v293_v3  ;;  %v296_v7 = vld [vmem:[%s288_s19 + $0x10] sm:$0xf]  ;;  %v541_v22 = vsel %vm539_vm1, %v505_v20, 0 }
  0x1a   : > { %v948_v6 = vcombine.low %v294_v2, %v295_v4  ;;  %v297_v8 = vld [vmem:[%s288_s19 + $0x14] sm:$0xf]  ;;  %v298_v11 = vld [vmem:[%s288_s19 + $0x18] sm:$0xf]  ;;  %v299_v12 = vld [vmem:[%s288_s19 + $0x1c] sm:$0xf]  ;;  %1053 = vmatpush3.bf16.msra.mxu1 %v541_v22 }
  0x1b   : > { %v949_v9 = vcombine.low %v296_v7, %v297_v8  ;;  %1044 = vmatprep.mubr.msk.bf16.mxu0 %vm407_vm0, %v947_v5  ;;  %v950_v14 = vcombine.low %v298_v11, %v299_v12  ;;  %v1416_v21 = vld [vmem:[%s1526_s3] sm:$0xff]   ;;  %1086 = vmatprep.subr.bf16.mxu1 %v1363_v10  ;;  %s996_s19 = sshll.u32 %s1323_s28, 9 }
  0x1c   : > { %1045 = vmatmul.mubr.msk.bf16.vlgmr.msra.gmra.mxu0 %vm407_vm0, %v948_v6  ;;  %v946_v40 = vld [vmem:[%s1525_s2] ss:$0 sm:$0xff]  ;;  %s1459_s23 = scalar_lea.hbm %s1529_s6, %s996_s19 }
  0x1d   : > { %310 = vrot.lane.b32.xlu0 %v293_v3, %s1256_s20  ;;  %314 = vrot.lane.b32.xlu1 %v295_v4, %s1256_s20 }
  0x1e   : > { %1048 = vmatprep.mubr.msk.bf16.mxu0 %vm407_vm0, %v949_v9  ;;  %1063 = vmatpush3.bf16.msra.mxu0 %v1363_v10 }
  0x1f   : > { %1064 = vmatprep.subr.bf16.mxu0 %v1368_v13 }
  0x21   : > { %316 = vrot.lane.b32.xlu0 %v296_v7, %s1256_s20  ;;  %318 = vrot.lane.b32.xlu1 %v297_v8, %s1256_s20 }
  0x22   : > { %1065 = vmatpush3.bf16.msra.mxu0 %v1368_v13 }
  0x23   : > { %1066 = vmatprep.subr.bf16.mxu0 %v1376_v15 }
  0x24   : > { %1049 = vmatmul.mubr.msk.bf16.gmra.mxu0 %vm407_vm0, %v950_v14 }
  0x25   : > { %320 = vrot.lane.b32.xlu0 %v298_v11, %s1256_s20  ;;  %322 = vrot.lane.b32.xlu1 %v299_v12, %s1256_s20  ;;  %s831_s20 = sshll.u32 %s1450_s18, 4  ;;  %s1461_s20 = int_to_ptr.vmem [resolvable:$true] %s831_s20 }
  0x26   : > { %1067 = vmatpush3.bf16.msra.mxu0 %v1376_v15  ;;  %p1171_p0 = scmp.lt.s32.totalorder %s1461_s20, %s1169_s13 }
  0x27   : > { %1068 = vmatprep.subr.bf16.mxu0 %v1384_v16 }
  0x2a   : > { %1069 = vmatpush3.bf16.msra.mxu0 %v1384_v16 }
  0x2b   : > { %1070 = vmatprep.subr.bf16.mxu0 %v1391_v17 }
  0x2e   : > { %1071 = vmatpush3.bf16.msra.mxu0 %v1391_v17 }
  0x2f   : > { %1072 = vmatprep.subr.bf16.mxu0 %v1399_v18 }
  0x32   : > { %1073 = vmatpush3.bf16.msra.mxu0 %v1399_v18 }
  0x33   : > { %1074 = vmatprep.subr.bf16.mxu0 %v1406_v19 }
  0x36   : > { %1075 = vmatpush3.bf16.msra.mxu0 %v1406_v19 }
  0x37   : > { %1076 = vmatprep.subr.bf16.mxu0 %v1416_v21 }
  0x3a   : > { %1077 = vmatpush3.bf16.msra.mxu0 %v1416_v21 }
  0x8b   : > { %v309_v23 = vpop.permute.xlu0 %308  ;;  %v313_v24 = vpop.permute.xlu1 %312 }
  0x8c   : > { %v332_v25 = vmax.bf16 %v309_v23, %v292_v1  ;;  %v334_v26 = vmax.bf16 %v313_v24, %v294_v2 }
  0x8e   : > { %348 = vrot.lane.b32.xlu0 %v332_v25, %s1257_s8 }
  0x8f   : > { %v311_v27 = vpop.permute.xlu0 %310  ;;  %v315_v28 = vpop.permute.xlu1 %314 }
  0x90   : > { %v333_v29 = vmax.bf16 %v311_v27, %v293_v3  ;;  %v335_v30 = vmax.bf16 %v315_v28, %v295_v4 }
  0x92   : > { %352 = vrot.lane.b32.xlu0 %v334_v26, %s1257_s8  ;;  %350 = vrot.lane.b32.xlu1 %v333_v29, %s1257_s8 }
  0x93   : > { %v317_v31 = vpop.permute.xlu0 %316  ;;  %v319_v32 = vpop.permute.xlu1 %318 }
  0x94   : > { %v336_v33 = vmax.bf16 %v317_v31, %v296_v7  ;;  %v337_v34 = vmax.bf16 %v319_v32, %v297_v8 }
  0x96   : > { %354 = vrot.lane.b32.xlu1 %v335_v30, %s1257_s8  ;;  %356 = vrot.lane.b32.xlu0 %v336_v33, %s1257_s8 }
  0x97   : > { %v321_v35 = vpop.permute.xlu0 %320  ;;  %v323_v36 = vpop.permute.xlu1 %322 }
  0x98   : > { %v338_v37 = vmax.bf16 %v321_v35, %v298_v11  ;;  %v339_v38 = vmax.bf16 %v323_v36, %v299_v12 }
  0x9a   : > { %358 = vrot.lane.b32.xlu1 %v337_v34, %s1257_s8  ;;  %360 = vrot.lane.b32.xlu0 %v338_v37, %s1257_s8 }
  0x9e   : > { %362 = vrot.lane.b32.xlu1 %v339_v38, %s1257_s8  ;;  %s1164_s8 = scalar_lea.vmem %s1461_s20, 512 }
  0x9f   : > { %p1165_p11 = scmp.ne.s32.totalorder %s1461_s20, %s1164_s8  ;;  %p1172_p1 = scmp.lt.s32.totalorder %s1170_s15, %s1164_s8 }
  0xa1   : > { %p1166_p12 = pnand %p1165_p11, %p1340_p5  ;;  %p1173_p2 = por %p1172_p1, %p1171_p0 }
  0xa3   : > { %p1167_p13 = pneg %p1166_p12 }
  0xa5   : > { %p1174_p3 = pnand %p1173_p2, %p1167_p13 }
  0xdc   : > { %v1046_v39 = vpop.f32.mrf.mxu0 }
  0xdd   : > { %v463_v42 = vadd.f32 %v1046_v39, %v946_v40 }
  0xde   : > { %v454_v41 = vpop.f32.mrf.mxu0 }
  0xdf   : > { %v455_v44 = vadd.f32 %v946_v40, %v454_v41 }
  0xe0   : > { %v1047_v43 = vpop.f32.mrf.mxu0 }
  0xe1   : > { %v466_v45 = vadd.f32 %v1047_v43, %v946_v40 }
  0xe2   : > { %v457_v46 = vpop.f32.mrf.mxu0 }
  0xe3   : > { %v458_v47 = vadd.f32 %v946_v40, %v457_v46  ;;  %v486_v48 = vpack.c.bf16 %v466_v45, %v463_v42 }
  0xe4   : > { %v1050_v50 = vpop.f32.mrf.mxu0 }
  0xe5   : > { %v485_v49 = vpack.c.bf16 %v458_v47, %v455_v44 }
  0xe6   : > { %v470_v52 = vpop.f32.mrf.mxu0 }
  0xe7   : > { %1078 = vmatprep.mubr.bf16.mxu0 %v485_v49  ;;  %v471_v5 = vadd.f32 %v946_v40, %v470_v52 }
  0xe8   : > { %1079 = vmatmul.mubr.bf16.vlgmr.msra.gmra.mxu0 %v486_v48  ;;  %v1051_v58 = vpop.f32.mrf.mxu0 }
  0xea   : > { %v473_v0 = vpop.f32.mrf.mxu0 }
  0xeb   : > { %v474_v6 = vadd.f32 %v946_v40, %v473_v0 }
  0xed   : > { %v487_v12 = vpack.c.bf16 %v474_v6, %v471_v5 }
 0x100   : > { %v349_v51 = vpop.permute.xlu0 %348 }
 0x101   : > { %v372_v55 = vmax.bf16 %v349_v51, %v332_v25 }
 0x104   : > { %v351_v53 = vpop.permute.xlu1 %350  ;;  %v353_v54 = vpop.permute.xlu0 %352 }
 0x105   : > { %v373_v56 = vmax.bf16 %v351_v53, %v333_v29  ;;  %v374_v61 = vmax.bf16 %v353_v54, %v334_v26 }
 0x107   : > { %v956_v57 = vcombine.low %v372_v55, %v373_v56 }
 0x108   : > { %v355_v59 = vpop.permute.xlu1 %354  ;;  %v357_v60 = vpop.permute.xlu0 %356 }
 0x109   : > { %v375_v62 = vmax.bf16 %v355_v59, %v335_v30  ;;  %1054 = vmatprep.mubr.msk.bf16.mxu1 %vm526_vm2, %v956_v57  ;;  %v376_v2 = vmax.bf16 %v357_v60, %v336_v33 }
 0x10b   : > { %v957_v63 = vcombine.low %v374_v61, %v375_v62 }
 0x10c   : > { %v359_v1 = vpop.permute.xlu1 %358  ;;  %v361_v4 = vpop.permute.xlu0 %360 }
 0x10d   : > { %v377_v3 = vmax.bf16 %v359_v1, %v337_v34  ;;  %1055 = vmatmul.mubr.msk.bf16.vlgmr.msra.gmra.mxu1 %vm526_vm2, %v957_v63  ;;  %v378_v9 = vmax.bf16 %v361_v4, %v338_v37 }
 0x10e   : > { %1094 = vmatpush3.bf16.msra.mxu1 %v1363_v10  ;;  %v479_v10 = vadd.f32 %v1050_v50, %v946_v40 }
 0x10f   : > { %v958_v7 = vcombine.low %v376_v2, %v377_v3  ;;  %1087 = vmatprep.subr.bf16.mxu1 %v1368_v13 }
 0x110   : > { %v363_v8 = vpop.permute.xlu1 %362 }
 0x111   : > { %v379_v11 = vmax.bf16 %v363_v8, %v339_v38  ;;  %1058 = vmatprep.mubr.msk.bf16.mxu1 %vm526_vm2, %v958_v7 }
 0x112   : > { %1095 = vmatpush3.bf16.msra.mxu1 %v1368_v13  ;;  %v482_v13 = vadd.f32 %v1051_v58, %v946_v40 }
 0x113   : > { %v959_v14 = vcombine.low %v378_v9, %v379_v11  ;;  %1088 = vmatprep.subr.bf16.mxu1 %v1376_v15 }
 0x115   : > { %1059 = vmatmul.mubr.msk.bf16.gmra.mxu1 %vm526_vm2, %v959_v14 }
 0x116   : > { %1096 = vmatpush3.bf16.msra.mxu1 %v1376_v15  ;;  %1082 = vmatprep.mubr.bf16.mxu1 %v487_v12  ;;  %v488_v15 = vpack.c.bf16 %v482_v13, %v479_v10 }
 0x117   : > { %1089 = vmatprep.subr.bf16.mxu1 %v1384_v16 }
 0x11a   : > { %1097 = vmatpush3.bf16.msra.mxu1 %v1384_v16 }
 0x11b   : > { %1090 = vmatprep.subr.bf16.mxu1 %v1391_v17 }
 0x11e   : > { %1098 = vmatpush3.bf16.msra.mxu1 %v1391_v17 }
 0x11f   : > { %1091 = vmatprep.subr.bf16.mxu1 %v1399_v18 }
 0x122   : > { %1099 = vmatpush3.bf16.msra.mxu1 %v1399_v18 }
 0x123   : > { %1092 = vmatprep.subr.bf16.mxu1 %v1406_v19 }
 0x126   : > { %1100 = vmatpush3.bf16.msra.mxu1 %v1406_v19  ;;  %v972_v19 = vld [vmem:[%s1528_s5] ss:$0 sm:$0xff] }
 0x127   : > { %1093 = vmatprep.subr.bf16.mxu1 %v1416_v21 }
 0x12a   : > { %1101 = vmatpush3.bf16.msra.mxu1 %v1416_v21 }
 0x12d   : > { %1083 = vmatmul.mubr.bf16.vlgmr.msra.gmra.mxu1 %v488_v15 }
 0x1a8   : > { %v1080_v16 = vpop.f32.mrf.mxu0 }
 0x1aa   : > { %v690_v20 = vpop.f32.mrf.mxu0 }
 0x1ac   : > { %v1081_v22 = vpop.f32.mrf.mxu0 }
 0x1ae   : > { %v693_v25 = vpop.f32.mrf.mxu0 }
 0x1cd   : > { %v1056_v17 = vpop.f32.mrf.mxu1 }
 0x1ce   : > { %v699_v18 = vadd.f32 %v1080_v16, %v1056_v17 }
 0x1cf   : > { %v577_v23 = vpop.f32.mrf.mxu1 }
 0x1d0   : > { %v691_v26 = vadd.f32 %v690_v20, %v577_v23  ;;  %v730_v28 = vadd.f32 %v972_v19, %v699_v18 }
 0x1d1   : > { %v1057_v24 = vpop.f32.mrf.mxu1 }
 0x1d2   : > { %v702_v21 = vadd.f32 %v1081_v22, %v1057_v24  ;;  %v728_v31 = vadd.f32 %v972_v19, %v691_v26  ;;  %v792_v46 = vmul.f32 %v730_v28, %v730_v28 }
 0x1d3   : > { %v580_v27 = vpop.f32.mrf.mxu1 }
 0x1d4   : > { %v731_v29 = vadd.f32 %v972_v19, %v702_v21  ;;  %v694_v30 = vadd.f32 %v693_v25, %v580_v27  ;;  %v790_v41 = vmul.f32 %v728_v31, %v728_v31 }
 0x1d5   : > { %v1060_v35 = vpop.f32.mrf.mxu1 }
 0x1d6   : > { %v1005_v32 = vpack.c.bf16 %v731_v29, %v730_v28  ;;  %v729_v33 = vadd.f32 %v972_v19, %v694_v30  ;;  %v793_v53 = vmul.f32 %v731_v29, %v731_v29 }
 0x1d7   : > { %v593_v36 = vpop.f32.mrf.mxu1 }
 0x1d8   : > { %1017 = vst [vmem:[%s1450_s18 + $0x8] sm:$0xff] %v1005_v32   ;;  %v1000_v34 = vpack.c.bf16 %v729_v33, %v728_v31  ;;  %v791_v38 = vmul.f32 %v729_v33, %v729_v33  ;;  %v776_v39 = vadd.f32 %v729_v33, %v728_v31 }
 0x1d9   : > { %v1061_v37 = vpop.f32.mrf.mxu1 }
 0x1da   : > { %1001 = vst [vmem:[%s1450_s18] sm:$0xff] %v1000_v34   ;;  %v798_v43 = vadd.f32 %v791_v38, %v790_v41  ;;  %v777_v44 = vadd.f32 %v776_v39, %v730_v28 }
 0x1db   : > { %v596_v40 = vpop.f32.mrf.mxu1 }
 0x1dc   : > { %v799_v50 = vadd.f32 %v798_v43, %v792_v46  ;;  %v778_v54 = vadd.f32 %v777_v44, %v731_v29 }
 0x1de   : > { %v800_v61 = vadd.f32 %v799_v50, %v793_v53 }
 0x1ed   : > { %v1084_v42 = vpop.f32.mrf.mxu1 }
 0x1ee   : > { %v715_v47 = vadd.f32 %v1084_v42, %v1060_v35 }
 0x1ef   : > { %v706_v45 = vpop.f32.mrf.mxu1 }
 0x1f0   : > { %v707_v48 = vadd.f32 %v706_v45, %v593_v36  ;;  %v734_v56 = vadd.f32 %v972_v19, %v715_v47 }
 0x1f1   : > { %v1085_v49 = vpop.f32.mrf.mxu1 }
 0x1f2   : > { %v732_v51 = vadd.f32 %v972_v19, %v707_v48  ;;  %v718_v52 = vadd.f32 %v1085_v49, %v1061_v37  ;;  %v796_v4 = vmul.f32 %v734_v56, %v734_v56 }
 0x1f3   : > { %v709_v55 = vpop.f32.mrf.mxu1 }
 0x1f4   : > { %v794_v57 = vmul.f32 %v732_v51, %v732_v51  ;;  %v735_v58 = vadd.f32 %v972_v19, %v718_v52  ;;  %v710_v59 = vadd.f32 %v709_v55, %v596_v40  ;;  %v779_v60 = vadd.f32 %v778_v54, %v732_v51 }
 0x1f6   : > { %v1015_v62 = vpack.c.bf16 %v735_v58, %v734_v56  ;;  %v733_v63 = vadd.f32 %v972_v19, %v710_v59  ;;  %v801_v0 = vadd.f32 %v800_v61, %v794_v57 }
 0x1f8   : > { %1019 = vst [vmem:[%s1450_s18 + $0x18] sm:$0xff] %v1015_v62   ;;  %v1010_v1 = vpack.c.bf16 %v733_v63, %v732_v51  ;;  %v780_v2 = vadd.f32 %v779_v60, %v733_v63  ;;  %v795_v3 = vmul.f32 %v733_v63, %v733_v63 }
 0x1fa   : > { %1018 = vst [vmem:[%s1450_s18 + $0x10] sm:$0xff] %v1010_v1   ;;  %v781_v5 = vadd.f32 %v780_v2, %v734_v56  ;;  %v802_v6 = vadd.f32 %v801_v0, %v795_v3 }
 0x1fb   : > { %1177 = shalt.err (!%p1174_p3)
}
 0x1fc   : > { %s1178_s16 = scalar_lea.hbm %s1459_s23, 512  ;;  %s1182_s19 = scalar_lea.hbm %s1529_s6, 1024 }
 0x1fd   : > { %p1179_p4 = scmp.ne.s32.totalorder %s1459_s23, %s1178_s16  ;;  %p1183_p9 = scmp.lt.s32.totalorder %s1459_s23, %s1529_s6 }
 0x1fe   : > { %p1184_p10 = scmp.lt.s32.totalorder %s1182_s19, %s1178_s16 }
 0x1ff   : > { %p1180_p7 = pnand %p1179_p4, %p1340_p5 }
 0x200   : > { %p1185_p11 = por %p1184_p10, %p1183_p9 }
 0x201   : > { %p1181_p8 = pneg %p1180_p7 }
 0x203   : > { %p1186_p12 = pnand %p1185_p11, %p1181_p8 }
 0x205   : > { %1189 = shalt.err (!%p1186_p12)
}
 0x206   : > { %s1259_s8 = smov 64   ;;  %s1260_s9 = smov 4   ;;  %v797_v7 = vmul.f32 %v735_v58, %v735_v58  ;;  %v782_v8 = vadd.f32 %v781_v5, %v735_v58  ;;  %v803_v9 = vadd.f32 %v802_v6, %v796_v4 }
 0x207   : > { %1103 = dma.vmem_to_hbm [thread:$0]  (%p1340_p5), %s1461_s20, 512, %s1459_s23, %s813_s29, %s1259_s8, %s1259_s8, %s1260_s9  }
 0x208   : > { %v783_v11 = vrot.slane %v782_v8, 4  ;;  %v804_v12 = vadd.f32 %v803_v9, %v797_v7  ;;  %s943_s13 = sshll.u32 %s1444_s14, 1  ;;  %s985_s15 = sshll.u32 %s1323_s28, 5 }
 0x209   : > { %s283_s16 = scalar_lea.vmem [#allocation4], %s943_s13  ;;  %s845_s29 = scalar_lea.hbm %s1530_s7, %s985_s15 }
 0x20a   : > { %v784_v14 = vadd.f32 %v783_v11, %v782_v8  ;;  %v805_v10 = vrot.slane %v804_v12, 4  ;;  %s847_s17 = sshll.u32 %s283_s16, 4  ;;  %s818_s18 = scalar_lea.sflag [#allocation5], %s1444_s14  ;;  %s848_s17 = int_to_ptr.vmem [resolvable:$true] %s847_s17 }
 0x20b   : > { %s1190_s19 = scalar_lea.vmem %s848_s17, 32  ;;  %s1261_s21 = smov [#allocation4]  }
 0x20c   : > { %v785_v13 = vrot.slane %v784_v14, 2  ;;  %v806_v15 = vadd.f32 %v805_v10, %v804_v12  ;;  %p1191_p13 = scmp.ne.s32.totalorder %s848_s17, %s1190_s19  ;;  %s1194_s28 = sshll.u32 %s1261_s21, 4  ;;  %s1195_s28 = int_to_ptr.vmem [resolvable:$false] %s1194_s28 }
 0x20d   : > { %s1196_s22 = scalar_lea.vmem %s1195_s28, 64  ;;  %p1197_p2 = scmp.lt.s32.totalorder %s848_s17, %s1195_s28 }
 0x20e   : > { %v786_v16 = vadd.f32 %v785_v13, %v784_v14  ;;  %v807_v20 = vrot.slane %v806_v15, 2  ;;  %p1192_p0 = pnand %p1191_p13, %p1340_p5  ;;  %p1198_p3 = scmp.lt.s32.totalorder %s1196_s22, %s1190_s19 }
 0x210   : > { %v787_v17 = vrot.slane %v786_v16, 1  ;;  %v808_v22 = vadd.f32 %v807_v20, %v806_v15  ;;  %p1193_p1 = pneg %p1192_p0  ;;  %p1199_p4 = por %p1198_p3, %p1197_p2 }
 0x212   : > { %v788_v23 = vadd.f32 %v787_v17, %v786_v16  ;;  %v809_v18 = vrot.slane %v808_v22, 1  ;;  %p1200_p7 = pnand %p1199_p4, %p1193_p1 }
 0x214   : > { %789 = vst [vmem:[%s283_s16] sm:$0x1] %v788_v23  ;;  %v810_v19 = vadd.f32 %v809_v18, %v808_v22 }
 0x216   : > { %811 = vst [vmem:[%s283_s16 + $0x1] sm:$0x1] %v810_v19 }
 0x217   : > { %1203 = shalt.err (!%p1200_p7)
}
 0x218   : > { %s1204_s8 = scalar_lea.hbm %s845_s29, 32  ;;  %s1208_s13 = scalar_lea.hbm %s1530_s7, 64 }
 0x219   : > { %p1205_p8 = scmp.ne.s32.totalorder %s845_s29, %s1204_s8  ;;  %p1209_p11 = scmp.lt.s32.totalorder %s845_s29, %s1530_s7 }
 0x21a   : > { %p1210_p12 = scmp.lt.s32.totalorder %s1208_s13, %s1204_s8 }
 0x21b   : > { %p1206_p9 = pnand %p1205_p8, %p1340_p5 }
 0x21c   : > { %p1211_p13 = por %p1210_p12, %p1209_p11 }
 0x21d   : > { %p1207_p10 = pneg %p1206_p9 }
 0x21f   : > { %p1212_p0 = pnand %p1211_p13, %p1207_p10 }
 0x221   : > { %1215 = shalt.err (!%p1212_p0)
}
 0x222   : > { %1104 = dma.vmem_to_hbm [thread:$0]  (%p1340_p5), %s848_s17, 32, %s845_s29, %s818_s18  }
 0x223 PF: > { %p1114_p1 = scmp.ge.s32.totalorder %s1254_s27, 2  ;;  %s859_s20 = sand.u32 1, %s1242_s24  }
 0x224   : > { %s860_s23 = scalar_lea.sflag [#allocation3], %s859_s20 }
 0x225   : > { %p1108_p2 = pnand %p1114_p1, %p1344_p6 }
 0x227   : > { %p1109_p3 = pneg %p1108_p2 }
 0x229   : > { %1233 = dma.done.wait (%p1109_p3), %s860_s23, 512  }
 0x22a   : > { %1235 = vsyncadd (%p1109_p3), %s860_s23, 4294966784  ;;  %s869_s19 = scalar_lea.sflag [#allocation5], %s859_s20 }
 0x22b   : > { %1237 = dma.done.wait (%p1109_p3), %s869_s19, 32  }
 0x22c   : > { %1239 = vsyncadd (%p1109_p3), %s869_s19, 4294967264  ;;  %p21_p5 = scmp.ge.s32.totalorder %s1327_s30, 4   ;;  %s1533_s24 = smov %s1246_s25 }
 0x22d   : > { %s1534_s25 = smov %s1250_s26  ;;  %s1535_s26 = smov %s1338_s10 }
 0x22e   : > { %s1536_s27 = smov %s1327_s30  ;;  %23 = sbr.rel (!%p21_p5) target bundleno = 5 (0x5), region = 96 }
 0x233   :  { %874 = vsyncpa [#allocation3], 1 }
 0x234   :  { %876 = vsyncpa [#allocation3 + $0x1], 1 }
 0x235   :  { %877 = vsyncpa [#allocation5], 1 }
 0x236   :  { %879 = vsyncpa [#allocation5 + $0x1], 1 }

</bundles_post_ra>
